<compile_context>
chip_gen: v6e
topology: v6e:2x2x1
jax: 0.10.0
libtpu: 0.0.40
codegen_flags: <defaults>
</compile_context>

<pallas_src>
import jax
import jax.numpy as jnp
import numpy as np
from jax.experimental import pallas as pl
from jax.experimental.pallas import tpu as pltpu


def value_mlp_kernel(x_ref, w1_ref, b1_ref, w2_ref, b2_ref, w3_ref, o_ref):
    # fc1 + relu : MXU matmul (bf16/f32 inputs), f32 accumulate, f32 epilogue.
    h1 = jnp.dot(x_ref[...], w1_ref[...], preferred_element_type=jnp.float32)
    h1 = jnp.maximum(h1 + b1_ref[...], 0.0)
    # fc2 + relu (cast back to the streaming dtype for the MXU, keep f32 acc).
    h2 = jnp.dot(h1.astype(w2_ref.dtype), w2_ref[...],
                 preferred_element_type=jnp.float32)
    h2 = jnp.maximum(h2 + b2_ref[...], 0.0)
    # fc_mean, packed: (P, P*H2) contracted against (TBr, P*H2) over the
    # feature axis -> lane-dense (P, TBr) block (q.k^T style, no relayout).
    v = jnp.einsum("oh,bh->ob", w3_ref[...], h2.astype(w3_ref.dtype),
                   preferred_element_type=jnp.float32)
    o_ref[...] = v.reshape(o_ref.shape)


def _round_up(n, m):
    return (n + m - 1) // m * m


def _block_diag(w, p):
    """(i, o) -> (p*i, p*o) block-diagonal matrix with p copies of w."""
    if p == 1:
        return w
    i, o = w.shape
    eye = jnp.eye(p, dtype=w.dtype)
    blk = eye[:, :, None, None] * w[None, None, :, :]        # (p, p, i, o)
    return blk.transpose(0, 2, 1, 3).reshape(p * i, p * o)


def value_forward(x, params, *, block_rows=None, compute_dtype=jnp.bfloat16):
    """x: (B, state_size) float32 -> (B,) float32."""
    w1, b1, w2, b2, w3, b3 = params
    B, S = x.shape
    H1 = w1.shape[1]
    H2 = w2.shape[1]

    # Pack P states per 128-lane row (P=4 for the 32-wide example); P=1
    # degenerates to the plain unpacked kernel for wide feature dims.
    P = max(1, 128 // max(S, H1, H2))

    rows = pl.cdiv(B, P)
    if block_rows is None:
        # Adaptive: large enough to amortize per-grid-step overhead, rounded
        # so mid-size batches do not pad to one huge tile.  Multiple of 128
        # keeps the (P, TBr) output block lane-dense.
        block_rows = min(8192, _round_up(rows, 256))
    TBr = int(block_rows)
    assert TBr % 128 == 0, "block_rows must be a multiple of 128"

    rows_pad = _round_up(rows, TBr)
    num_tiles = rows_pad // TBr
    B_pad = rows_pad * P
    if B_pad != B:
        x = jnp.pad(x, ((0, B_pad - B), (0, 0)))   # zero rows -> sliced off

    # Packed x and block-diagonal weights (weights are tiny; built per call).
    xp = x.reshape(rows_pad, P * S).astype(compute_dtype)
    w1b = _block_diag(w1, P).astype(compute_dtype)           # (P*S , P*H1)
    w2b = _block_diag(w2, P).astype(compute_dtype)           # (P*H1, P*H2)
    w3b = _block_diag(w3, P).astype(compute_dtype)           # (P   , P*H2)
    b1b = jnp.tile(b1, (1, P)).astype(jnp.float32)           # f32 epilogue
    b2b = jnp.tile(b2, (1, P)).astype(jnp.float32)

    out = pl.pallas_call(
        value_mlp_kernel,
        out_shape=jax.ShapeDtypeStruct((num_tiles, P, TBr), jnp.float32),
        grid=(num_tiles,),
        in_specs=[
            pl.BlockSpec((TBr, P * S), lambda i: (i, 0)),     # x streams
            pl.BlockSpec((P * S, P * H1), lambda i: (0, 0)),  # weights resident
            pl.BlockSpec((1, P * H1), lambda i: (0, 0)),
            pl.BlockSpec((P * H1, P * H2), lambda i: (0, 0)),
            pl.BlockSpec((1, P * H2), lambda i: (0, 0)),
            pl.BlockSpec((P, P * H2), lambda i: (0, 0)),      # fc_mean block
        ],
        out_specs=pl.BlockSpec((1, P, TBr), lambda i: (i, 0, 0)),
        compiler_params=pltpu.CompilerParams(
            dimension_semantics=("parallel",)),
    )(xp, w1b, b1b, w2b, b2b, w3b)

    # out[t, p, r] = value of state (t*TBr + r)*P + p  -> flat (B,) order.
    values = out.transpose(0, 2, 1).reshape(-1)[:B]
    # torch.reshape(x, (-1,)); scalar fc_mean bias added here (no (1,1) DMA).
    return values + b3


def xavier_uniform(key, fan_in, fan_out, shape, gain=1.0):
    # torch.nn.init.xavier_uniform_ with gain=1
    limit = gain * np.sqrt(6.0 / (fan_in + fan_out))
    return jax.random.uniform(key, shape, jnp.float32,
                              minval=-limit, maxval=limit)


def init_value_params(key, state_size, hidden_sizes):
    k1, k2, k3 = jax.random.split(key, 3)
    # stored as (in, out) so the kernel computes x @ W directly
    w1 = xavier_uniform(k1, state_size, hidden_sizes[0],
                        (state_size, hidden_sizes[0]))
    b1 = jnp.zeros((1, hidden_sizes[0]), jnp.float32)
    w2 = xavier_uniform(k2, hidden_sizes[0], hidden_sizes[1],
                        (hidden_sizes[0], hidden_sizes[1]))
    b2 = jnp.zeros((1, hidden_sizes[1]), jnp.float32)
    # fc_mean weight kept as torch-native (out=1, in=H2) row
    w3 = xavier_uniform(k3, hidden_sizes[1], 1, (1, hidden_sizes[1]))
    b3 = jnp.zeros((1,), jnp.float32)
    return (w1, b1, w2, b2, w3, b3)


def reference_forward(x, params):
    # pure-JAX f32 reference (same op structure as the torch module)
    w1, b1, w2, b2, w3, b3 = params
    h = jnp.maximum(x @ w1 + b1, 0.0)
    h = jnp.maximum(h @ w2 + b2, 0.0)
    return (h @ w3.T).reshape(-1) + b3


if __name__ == "__main__":
    key = jax.random.PRNGKey(0)
    state_size = 32
    hidden_sizes = (32, 32)
    batch = 8

    kx, kp, kx2 = jax.random.split(key, 3)
    x = jax.random.normal(kx, (batch, state_size), jnp.float32)
    params = init_value_params(kp, state_size, hidden_sizes)
    ref = jax.block_until_ready(reference_forward(x, params))

    # f32 compute path: tight check of the packed / block-diagonal math.
    v_f32 = jax.block_until_ready(
        value_forward(x, params, compute_dtype=jnp.float32))
    assert v_f32.shape == (batch,)
    np.testing.assert_allclose(np.asarray(v_f32), np.asarray(ref),
                               rtol=1e-3, atol=1e-3)

    # Default bf16 streaming path (f32 accumulation) vs the f32 reference.
    v_bf16 = jax.block_until_ready(value_forward(x, params))
    assert v_bf16.shape == (batch,)
    np.testing.assert_allclose(np.asarray(v_bf16), np.asarray(ref),
                               rtol=3e-2, atol=3e-2)

    # Multi-tile path: several grid steps streaming packed x tiles.
    batch2 = 1000
    x2 = jax.random.normal(kx2, (batch2, state_size), jnp.float32)
    v2 = jax.block_until_ready(value_forward(x2, params, block_rows=128))
    assert v2.shape == (batch2,)
    ref2 = jax.block_until_ready(reference_forward(x2, params))
    np.testing.assert_allclose(np.asarray(v2), np.asarray(ref2),
                               rtol=3e-2, atol=3e-2)

    print("KERNEL_OK")
</pallas_src>

<mosaic_0001>
module attributes {stable_mosaic.version = 11 : i64} {
  func.func @value_mlp_kernel(%arg0: i32, %arg1: memref<256x128xf32, #tpu.memory_space<vmem>>, %arg2: memref<128x128xf32, #tpu.memory_space<vmem>>, %arg3: memref<1x128xf32, #tpu.memory_space<vmem>>, %arg4: memref<128x128xf32, #tpu.memory_space<vmem>>, %arg5: memref<1x128xf32, #tpu.memory_space<vmem>>, %arg6: memref<4x128xf32, #tpu.memory_space<vmem>>, %arg7: memref<1x4x256xf32, #tpu.memory_space<vmem>>) attributes {dimension_semantics = [#tpu.dimension_semantics<parallel>], iteration_bounds = array<i64: 1>, scalar_prefetch = 0 : i64, scratch_operands = 0 : i64, tpu.core_type = #tpu.core_type<tc>, window_params = [{transform_indices = @transform_0, window_bounds = array<i64: 256, 128>}, {pipeline_mode = #tpu.pipeline_mode<synchronous>, transform_indices = @transform_1, window_bounds = array<i64: 128, 128>}, {pipeline_mode = #tpu.pipeline_mode<synchronous>, transform_indices = @transform_2, window_bounds = array<i64: 1, 128>}, {pipeline_mode = #tpu.pipeline_mode<synchronous>, transform_indices = @transform_3, window_bounds = array<i64: 128, 128>}, {pipeline_mode = #tpu.pipeline_mode<synchronous>, transform_indices = @transform_4, window_bounds = array<i64: 1, 128>}, {pipeline_mode = #tpu.pipeline_mode<synchronous>, transform_indices = @transform_5, window_bounds = array<i64: 4, 128>}, {transform_indices = @transform_6, window_bounds = array<i64: 1, 4, 256>}]} {
    %c0 = arith.constant 0 : index
    %c0_0 = arith.constant 0 : index
    %0 = vector.load %arg1[%c0, %c0_0] : memref<256x128xf32, #tpu.memory_space<vmem>>, vector<256x128xf32>
    %c0_1 = arith.constant 0 : index
    %c0_2 = arith.constant 0 : index
    %1 = vector.load %arg2[%c0_1, %c0_2] : memref<128x128xf32, #tpu.memory_space<vmem>>, vector<128x128xf32>
    %cst = arith.constant dense<0.000000e+00> : vector<256x128xf32>
    %2 = tpu.matmul %0, %1, %cst {dimension_numbers = #tpu.dot_dimension_numbers<[1], [0], [0], [1], [0, 0, 1, 1], [], []>} : vector<256x128xf32>, vector<128x128xf32>, vector<256x128xf32> -> vector<256x128xf32>
    %c0_3 = arith.constant 0 : index
    %c0_4 = arith.constant 0 : index
    %3 = vector.load %arg3[%c0_3, %c0_4] : memref<1x128xf32, #tpu.memory_space<vmem>>, vector<1x128xf32>
    %4 = vector.broadcast %3 : vector<1x128xf32> to vector<256x128xf32>
    %5 = arith.addf %2, %4 : vector<256x128xf32>
    %cst_5 = arith.constant 0.000000e+00 : f32
    %6 = vector.broadcast %cst_5 : f32 to vector<256x128xf32>
    %7 = arith.maximumf %5, %6 : vector<256x128xf32>
    %c0_6 = arith.constant 0 : index
    %c0_7 = arith.constant 0 : index
    %8 = vector.load %arg4[%c0_6, %c0_7] : memref<128x128xf32, #tpu.memory_space<vmem>>, vector<128x128xf32>
    %cst_8 = arith.constant dense<0.000000e+00> : vector<256x128xf32>
    %9 = tpu.matmul %7, %8, %cst_8 {dimension_numbers = #tpu.dot_dimension_numbers<[1], [0], [0], [1], [0, 0, 1, 1], [], []>} : vector<256x128xf32>, vector<128x128xf32>, vector<256x128xf32> -> vector<256x128xf32>
    %c0_9 = arith.constant 0 : index
    %c0_10 = arith.constant 0 : index
    %10 = vector.load %arg5[%c0_9, %c0_10] : memref<1x128xf32, #tpu.memory_space<vmem>>, vector<1x128xf32>
    %11 = vector.broadcast %10 : vector<1x128xf32> to vector<256x128xf32>
    %12 = arith.addf %9, %11 : vector<256x128xf32>
    %cst_11 = arith.constant 0.000000e+00 : f32
    %13 = vector.broadcast %cst_11 : f32 to vector<256x128xf32>
    %14 = arith.maximumf %12, %13 : vector<256x128xf32>
    %c0_12 = arith.constant 0 : index
    %c0_13 = arith.constant 0 : index
    %15 = vector.load %arg6[%c0_12, %c0_13] : memref<4x128xf32, #tpu.memory_space<vmem>>, vector<4x128xf32>
    "tpu.trace_start"() <{level = 10 : i32, message = "oh,bh->ob"}> : () -> ()
    %cst_14 = arith.constant dense<0.000000e+00> : vector<4x256xf32>
    %16 = tpu.matmul %15, %14, %cst_14 {dimension_numbers = #tpu.dot_dimension_numbers<[1], [1], [0], [0], [0, 0, 1, 0], [], []>} : vector<4x128xf32>, vector<256x128xf32>, vector<4x256xf32> -> vector<4x256xf32>
    "tpu.trace_stop"() : () -> ()
    %17 = vector.shape_cast %16 : vector<4x256xf32> to vector<1x4x256xf32>
    %c0_15 = arith.constant 0 : index
    %c0_16 = arith.constant 0 : index
    %c0_17 = arith.constant 0 : index
    %18 = vector.load %arg7[%c0_15, %c0_16, %c0_17] : memref<1x4x256xf32, #tpu.memory_space<vmem>>, vector<1x4x256xf32>
    tpu.vector_store %arg7[%c0_15, %c0_16, %c0_17], %17 {strides = array<i32>} : memref<1x4x256xf32, #tpu.memory_space<vmem>>, vector<1x4x256xf32>,
    return
  }
  func.func @transform_0(%arg0: i32) -> (i32, i32) {
    %c0_i32 = arith.constant 0 : i32
    %c0_i32_0 = arith.constant 0 : i32
    return %arg0, %c0_i32 : i32, i32
  }
  func.func @transform_1(%arg0: i32) -> (i32, i32) {
    %c0_i32 = arith.constant 0 : i32
    %c0_i32_0 = arith.constant 0 : i32
    %c0_i32_1 = arith.constant 0 : i32
    return %c0_i32, %c0_i32_0 : i32, i32
  }
  func.func @transform_2(%arg0: i32) -> (i32, i32) {
    %c0_i32 = arith.constant 0 : i32
    %c0_i32_0 = arith.constant 0 : i32
    %c0_i32_1 = arith.constant 0 : i32
    return %c0_i32, %c0_i32_0 : i32, i32
  }
  func.func @transform_3(%arg0: i32) -> (i32, i32) {
    %c0_i32 = arith.constant 0 : i32
    %c0_i32_0 = arith.constant 0 : i32
    %c0_i32_1 = arith.constant 0 : i32
    return %c0_i32, %c0_i32_0 : i32, i32
  }
  func.func @transform_4(%arg0: i32) -> (i32, i32) {
    %c0_i32 = arith.constant 0 : i32
    %c0_i32_0 = arith.constant 0 : i32
    %c0_i32_1 = arith.constant 0 : i32
    return %c0_i32, %c0_i32_0 : i32, i32
  }
  func.func @transform_5(%arg0: i32) -> (i32, i32) {
    %c0_i32 = arith.constant 0 : i32
    %c0_i32_0 = arith.constant 0 : i32
    %c0_i32_1 = arith.constant 0 : i32
    return %c0_i32, %c0_i32_0 : i32, i32
  }
  func.func @transform_6(%arg0: i32) -> (i32, i32, i32) {
    %c0_i32 = arith.constant 0 : i32
    %c0_i32_0 = arith.constant 0 : i32
    %c0_i32_1 = arith.constant 0 : i32
    return %arg0, %c0_i32, %c0_i32_0 : i32, i32, i32
  }
}

</mosaic_0001>

<bundles_post_ra>
// kernel: tpu_custom_call.1
= control target key start
LH: loop header
LB: loop body
LE: loop exit
PB: predicated region body
PF: predicated region fallthrough
CT: control target
= control target key end

     0   :  { %11 = vsyncpa [#allocation3], 0  ;;  %s1313_s0 = inlined_call_operand.hbm [shape: f32[256,128], index: 0, kind: input, shape index: {}]   ;;  %s1314_s1 = inlined_call_operand.hbm [shape: f32[128,128], index: 1, kind: input, shape index: {}]   ;;  %s1315_s2 = inlined_call_operand.vmem [shape: f32[1,128], index: 2, kind: input, shape index: {}]   ;;  %s1316_s3 = inlined_call_operand.hbm [shape: f32[128,128], index: 3, kind: input, shape index: {}]   ;;  %s1317_s4 = inlined_call_operand.vmem [shape: f32[1,128], index: 4, kind: input, shape index: {}]   ;;  %s1318_s5 = inlined_call_operand.vmem [shape: f32[4,128], index: 5, kind: input, shape index: {}]   ;;  %s1319_s6 = inlined_call_operand.hbm [shape: f32[1,4,256], index: 6, kind: output, shape index: {}]  }
   0x1   :  { %12 = vsyncpa [#allocation6], 0 }
   0x2   :  { %13 = vsyncpa [#allocation4], 0  ;;  %s1134_s21 = smov [#allocation5]   ;;  %s1135_s23 = smov [#allocation2]  }
   0x3   :  { %s31_s22 = sshll.u32 %s1134_s21, 4  ;;  %s19_s24 = sshll.u32 %s1135_s23, 4  ;;  %s32_s22 = int_to_ptr.vmem [resolvable:$true] %s31_s22  ;;  %s20_s24 = int_to_ptr.vmem [resolvable:$true] %s19_s24 }
   0x4   :  { %s1056_s25 = scalar_lea.vmem %s32_s22, 2048  ;;  %p1061_p1 = scmp.lt.s32.totalorder %s32_s22, %s32_s22 }
   0x5   :  { %p1057_p0 = scmp.ne.s32.totalorder %s32_s22, %s1056_s25  ;;  %p1062_p2 = scmp.lt.s32.totalorder %s1056_s25, %s1056_s25 }
   0x7   :  { %p1063_p3 = por %p1062_p2, %p1061_p1 }
   0x9   :  { %p1064_p4 = pnand %p1063_p3, %p1057_p0 }
   0xb   :  { %1067 = shalt.err (!%p1064_p4)
}
   0xc   :  { %s1136_s26 = smov 128   ;;  %s1137_s27 = smov 8  }
   0xd   :  { %37 = dma.hbm_to_vmem [thread:$0]  %s1314_s1, 2048, %s32_s22, [#allocation6], %s1136_s26, %s1136_s26, %s1137_s27  }
   0xe   :  { %s1076_s30 = scalar_lea.vmem %s20_s24, 4096  ;;  %p1081_p6 = scmp.lt.s32.totalorder %s20_s24, %s20_s24 }
   0xf   :  { %p1077_p5 = scmp.ne.s32.totalorder %s20_s24, %s1076_s30  ;;  %p1082_p7 = scmp.lt.s32.totalorder %s1076_s30, %s1076_s30 }
  0x11   :  { %p1083_p8 = por %p1082_p7, %p1081_p6 }
  0x13   :  { %p1084_p9 = pnand %p1083_p8, %p1077_p5 }
  0x15   :  { %1087 = shalt.err (!%p1084_p9)
}
  0x16   :  { %25 = dma.hbm_to_vmem [thread:$0]  %s1313_s0, 4096, %s20_s24, [#allocation3], %s1136_s26, %s1136_s26, %s1137_s27  }
  0x17   :  { %s1138_s9 = smov [#allocation7]  }
  0x18   :  { %s45_s10 = sshll.u32 %s1138_s9, 4  ;;  %s46_s10 = int_to_ptr.vmem [resolvable:$true] %s45_s10 }
  0x19   :  { %s1096_s11 = scalar_lea.vmem %s46_s10, 2048  ;;  %p1101_p11 = scmp.lt.s32.totalorder %s46_s10, %s46_s10 }
  0x1a   :  { %p1097_p10 = scmp.ne.s32.totalorder %s46_s10, %s1096_s11  ;;  %p1102_p12 = scmp.lt.s32.totalorder %s1096_s11, %s1096_s11 }
  0x1c   :  { %p1103_p13 = por %p1102_p12, %p1101_p11 }
  0x1e   :  { %p1104_p0 = pnand %p1103_p13, %p1097_p10 }
  0x20   :  { %1107 = shalt.err (!%p1104_p0)
}
  0x21   :  { %51 = dma.hbm_to_vmem [thread:$0]  %s1316_s3, 2048, %s46_s10, [#allocation6], %s1136_s26, %s1136_s26, %s1137_s27  }
  0x22   :  { %1128 = dma.done.wait [#allocation3], 4096  }
  0x23   :  { %1129 = vsyncadd [#allocation3], 4294963200 }
  0x24   :  { %1130 = dma.done.wait [#allocation6], 4096  }
  0x25   :  { %1131 = vsyncadd [#allocation6], 4294963200  ;;  %v112_v0 = vld [vmem:[#allocation5 + $0x78] sm:$0xff]  ;;  %v111_v1 = vld [vmem:[#allocation5 + $0x70] sm:$0xff] }
  0x26   :  { %882 = vmatprep.subr.mxu0 %v112_v0  ;;  %v110_v2 = vld [vmem:[#allocation5 + $0x68] sm:$0xff]  ;;  %v109_v3 = vld [vmem:[#allocation5 + $0x60] sm:$0xff]  ;;  %v108_v5 = vld [vmem:[#allocation5 + $0x58] sm:$0xff] }
  0x27   :  { %883 = vmatpush3.msra.mxu0 %v112_v0  ;;  %v65_v4 = vld [vmem:[#allocation2] sm:$0xff]  ;;  %v107_v6 = vld [vmem:[#allocation5 + $0x50] sm:$0xff]  ;;  %v106_v7 = vld [vmem:[#allocation5 + $0x48] sm:$0xff] }
  0x28   :  { %884 = vmatprep.subr.mxu0 %v111_v1  ;;  %914 = vmatprep.mubr.f32.mxu0 %v65_v4  ;;  %v105_v8 = vld [vmem:[#allocation5 + $0x40] sm:$0xff]  ;;  %v104_v9 = vld [vmem:[#allocation5 + $0x38] sm:$0xff]  ;;  %v103_v10 = vld [vmem:[#allocation5 + $0x30] sm:$0xff] }
  0x29   :  { %885 = vmatpush3.msra.mxu0 %v111_v1  ;;  %v392_v11 = vld [vmem:[#allocation7 + $0x78] sm:$0xff]  ;;  %v391_v12 = vld [vmem:[#allocation7 + $0x70] sm:$0xff]  ;;  %v102_v13 = vld [vmem:[#allocation5 + $0x28] sm:$0xff] }
  0x2a   :  { %886 = vmatprep.subr.mxu0 %v110_v2  ;;  %962 = vmatprep.subr.mxu1 %v392_v11  ;;  %v390_v14 = vld [vmem:[#allocation7 + $0x68] sm:$0xff]  ;;  %v101_v15 = vld [vmem:[#allocation5 + $0x20] sm:$0xff]  ;;  %v100_v17 = vld [vmem:[#allocation5 + $0x18] sm:$0xff] }
  0x2b   :  { %887 = vmatpush3.msra.mxu0 %v110_v2  ;;  %963 = vmatpush3.msra.mxu1 %v392_v11  ;;  %v389_v16 = vld [vmem:[#allocation7 + $0x60] sm:$0xff]  ;;  %v388_v18 = vld [vmem:[#allocation7 + $0x58] sm:$0xff]  ;;  %v99_v19 = vld [vmem:[#allocation5 + $0x10] sm:$0xff] }
  0x2c   :  { %888 = vmatprep.subr.mxu0 %v109_v3  ;;  %964 = vmatprep.subr.mxu1 %v391_v12  ;;  %v387_v20 = vld [vmem:[#allocation7 + $0x50] sm:$0xff]  ;;  %v98_v21 = vld [vmem:[#allocation5 + $0x8] sm:$0xff]  ;;  %v97_v23 = vld [vmem:[#allocation5] sm:$0xff] }
  0x2d   :  { %889 = vmatpush3.msra.mxu0 %v109_v3  ;;  %965 = vmatpush3.msra.mxu1 %v391_v12  ;;  %v386_v22 = vld [vmem:[#allocation7 + $0x48] sm:$0xff]  ;;  %v385_v24 = vld [vmem:[#allocation7 + $0x40] sm:$0xff]  ;;  %v384_v26 = vld [vmem:[#allocation7 + $0x38] sm:$0xff] }
  0x2e   :  { %890 = vmatprep.subr.mxu0 %v108_v5  ;;  %966 = vmatprep.subr.mxu1 %v390_v14  ;;  %v66_v25 = vld [vmem:[#allocation2 + $0x8] sm:$0xff]  ;;  %v67_v27 = vld [vmem:[#allocation2 + $0x10] sm:$0xff]  ;;  %v68_v29 = vld [vmem:[#allocation2 + $0x18] sm:$0xff] }
  0x2f   :  { %891 = vmatpush3.msra.mxu0 %v108_v5  ;;  %967 = vmatpush3.msra.mxu1 %v390_v14  ;;  %v383_v28 = vld [vmem:[#allocation7 + $0x30] sm:$0xff]  ;;  %v382_v30 = vld [vmem:[#allocation7 + $0x28] sm:$0xff]  ;;  %v69_v31 = vld [vmem:[#allocation2 + $0x20] sm:$0xff] }
  0x30   :  { %892 = vmatprep.subr.mxu0 %v107_v6  ;;  %968 = vmatprep.subr.mxu1 %v389_v16  ;;  %v381_v32 = vld [vmem:[#allocation7 + $0x20] sm:$0xff]  ;;  %v70_v33 = vld [vmem:[#allocation2 + $0x28] sm:$0xff]  ;;  %v71_v34 = vld [vmem:[#allocation2 + $0x30] sm:$0xff] }
  0x31   :  { %893 = vmatpush3.msra.mxu0 %v107_v6  ;;  %969 = vmatpush3.msra.mxu1 %v389_v16  ;;  %v72_v35 = vld [vmem:[#allocation2 + $0x38] sm:$0xff]  ;;  %v73_v36 = vld [vmem:[#allocation2 + $0x40] sm:$0xff]  ;;  %v74_v37 = vld [vmem:[#allocation2 + $0x48] sm:$0xff] }
  0x32   :  { %894 = vmatprep.subr.mxu0 %v106_v7  ;;  %970 = vmatprep.subr.mxu1 %v388_v18  ;;  %v75_v38 = vld [vmem:[#allocation2 + $0x50] sm:$0xff]  ;;  %v76_v39 = vld [vmem:[#allocation2 + $0x58] sm:$0xff]  ;;  %v77_v40 = vld [vmem:[#allocation2 + $0x60] sm:$0xff] }
  0x33   :  { %895 = vmatpush3.msra.mxu0 %v106_v7  ;;  %971 = vmatpush3.msra.mxu1 %v388_v18  ;;  %v78_v41 = vld [vmem:[#allocation2 + $0x68] sm:$0xff]  ;;  %v79_v42 = vld [vmem:[#allocation2 + $0x70] sm:$0xff]  ;;  %v80_v43 = vld [vmem:[#allocation2 + $0x78] sm:$0xff] }
  0x34   :  { %896 = vmatprep.subr.mxu0 %v105_v8  ;;  %972 = vmatprep.subr.mxu1 %v387_v20  ;;  %v81_v44 = vld [vmem:[#allocation2 + $0x80] sm:$0xff]  ;;  %v82_v45 = vld [vmem:[#allocation2 + $0x88] sm:$0xff]  ;;  %v83_v46 = vld [vmem:[#allocation2 + $0x90] sm:$0xff] }
  0x35   :  { %897 = vmatpush3.msra.mxu0 %v105_v8  ;;  %973 = vmatpush3.msra.mxu1 %v387_v20  ;;  %v84_v47 = vld [vmem:[#allocation2 + $0x98] sm:$0xff]  ;;  %v85_v48 = vld [vmem:[#allocation2 + $0xa0] sm:$0xff]  ;;  %v86_v49 = vld [vmem:[#allocation2 + $0xa8] sm:$0xff] }
  0x36   :  { %898 = vmatprep.subr.mxu0 %v104_v9  ;;  %974 = vmatprep.subr.mxu1 %v386_v22  ;;  %v87_v50 = vld [vmem:[#allocation2 + $0xb0] sm:$0xff]  ;;  %v88_v51 = vld [vmem:[#allocation2 + $0xb8] sm:$0xff]  ;;  %v89_v52 = vld [vmem:[#allocation2 + $0xc0] sm:$0xff] }
  0x37   :  { %899 = vmatpush3.msra.mxu0 %v104_v9  ;;  %975 = vmatpush3.msra.mxu1 %v386_v22  ;;  %v90_v53 = vld [vmem:[#allocation2 + $0xc8] sm:$0xff]  ;;  %v91_v54 = vld [vmem:[#allocation2 + $0xd0] sm:$0xff]  ;;  %v92_v55 = vld [vmem:[#allocation2 + $0xd8] sm:$0xff] }
  0x38   :  { %900 = vmatprep.subr.mxu0 %v103_v10  ;;  %976 = vmatprep.subr.mxu1 %v385_v24  ;;  %v93_v56 = vld [vmem:[#allocation2 + $0xe0] sm:$0xff]  ;;  %v94_v57 = vld [vmem:[#allocation2 + $0xe8] sm:$0xff]  ;;  %v95_v58 = vld [vmem:[#allocation2 + $0xf0] sm:$0xff] }
  0x39   :  { %901 = vmatpush3.msra.mxu0 %v103_v10  ;;  %977 = vmatpush3.msra.mxu1 %v385_v24  ;;  %v96_v59 = vld [vmem:[#allocation2 + $0xf8] sm:$0xff]  ;;  %v379_v61 = vld [vmem:[#allocation7 + $0x10] sm:$0xff]  ;;  %v378_v62 = vld [vmem:[#allocation7 + $0x8] sm:$0xff] }
  0x3a   :  { %902 = vmatprep.subr.mxu0 %v102_v13  ;;  %978 = vmatprep.subr.mxu1 %v384_v26  ;;  %v380_v60 = vld [vmem:[#allocation7 + $0x18] sm:$0xff]  ;;  %v377_v63 = vld [vmem:[#allocation7] sm:$0xff] }
  0x3b   :  { %903 = vmatpush3.msra.mxu0 %v102_v13  ;;  %979 = vmatpush3.msra.mxu1 %v384_v26  ;;  %v1187_v0 = vld [vmem:[%s1315_s2] ss:$0 sm:$0xff] }
  0x3c   :  { %904 = vmatprep.subr.mxu0 %v101_v15  ;;  %980 = vmatprep.subr.mxu1 %v383_v28 }
  0x3d   :  { %905 = vmatpush3.msra.mxu0 %v101_v15  ;;  %981 = vmatpush3.msra.mxu1 %v383_v28 }
  0x3e   :  { %906 = vmatprep.subr.mxu0 %v100_v17  ;;  %982 = vmatprep.subr.mxu1 %v382_v30 }
  0x3f   :  { %907 = vmatpush3.msra.mxu0 %v100_v17  ;;  %983 = vmatpush3.msra.mxu1 %v382_v30 }
  0x40   :  { %908 = vmatprep.subr.mxu0 %v99_v19  ;;  %984 = vmatprep.subr.mxu1 %v381_v32 }
  0x41   :  { %909 = vmatpush3.msra.mxu0 %v99_v19  ;;  %985 = vmatpush3.msra.mxu1 %v381_v32 }
  0x42   :  { %910 = vmatprep.subr.mxu0 %v98_v21  ;;  %986 = vmatprep.subr.mxu1 %v380_v60 }
  0x43   :  { %911 = vmatpush3.msra.mxu0 %v98_v21  ;;  %987 = vmatpush3.msra.mxu1 %v380_v60 }
  0x44   :  { %912 = vmatprep.subr.mxu0 %v97_v23  ;;  %988 = vmatprep.subr.mxu1 %v379_v61 }
  0x45   :  { %913 = vmatpush3.msra.mxu0 %v97_v23  ;;  %989 = vmatpush3.msra.mxu1 %v379_v61 }
  0x46   :  { %915 = vmatmul.mubr.f32.vlgmr.msra.gmra.mxu0 %v66_v25  ;;  %990 = vmatprep.subr.mxu1 %v378_v62 }
  0x47   :  { %917 = vmatprep.mubr.f32.mxu0 %v67_v27  ;;  %991 = vmatpush3.msra.mxu1 %v378_v62 }
  0x48   :  { %992 = vmatprep.subr.mxu1 %v377_v63 }
  0x49   :  { %993 = vmatpush3.msra.mxu1 %v377_v63 }
  0x4a   :  { %918 = vmatmul.mubr.f32.gmra.mxu0 %v68_v29 }
  0x4b   :  { %920 = vmatprep.mubr.f32.mxu0 %v69_v31 }
  0x4e   :  { %921 = vmatmul.mubr.f32.gmra.mxu0 %v70_v33 }
  0x4f   :  { %923 = vmatprep.mubr.f32.mxu0 %v71_v34 }
  0x52   :  { %924 = vmatmul.mubr.f32.gmra.mxu0 %v72_v35 }
  0x53   :  { %926 = vmatprep.mubr.f32.mxu0 %v73_v36 }
  0x56   :  { %927 = vmatmul.mubr.f32.gmra.mxu0 %v74_v37 }
  0x57   :  { %929 = vmatprep.mubr.f32.mxu0 %v75_v38 }
  0x5a   :  { %930 = vmatmul.mubr.f32.gmra.mxu0 %v76_v39 }
  0x5b   :  { %932 = vmatprep.mubr.f32.mxu0 %v77_v40 }
  0x5e   :  { %933 = vmatmul.mubr.f32.gmra.mxu0 %v78_v41 }
  0x5f   :  { %935 = vmatprep.mubr.f32.mxu0 %v79_v42 }
  0x62   :  { %936 = vmatmul.mubr.f32.gmra.mxu0 %v80_v43 }
  0x63   :  { %938 = vmatprep.mubr.f32.mxu0 %v81_v44 }
  0x66   :  { %939 = vmatmul.mubr.f32.gmra.mxu0 %v82_v45 }
  0x67   :  { %941 = vmatprep.mubr.f32.mxu0 %v83_v46 }
  0x6a   :  { %942 = vmatmul.mubr.f32.gmra.mxu0 %v84_v47 }
  0x6b   :  { %944 = vmatprep.mubr.f32.mxu0 %v85_v48 }
  0x6e   :  { %945 = vmatmul.mubr.f32.gmra.mxu0 %v86_v49 }
  0x6f   :  { %947 = vmatprep.mubr.f32.mxu0 %v87_v50 }
  0x72   :  { %948 = vmatmul.mubr.f32.gmra.mxu0 %v88_v51 }
  0x73   :  { %950 = vmatprep.mubr.f32.mxu0 %v89_v52 }
  0x76   :  { %951 = vmatmul.mubr.f32.gmra.mxu0 %v90_v53 }
  0x77   :  { %953 = vmatprep.mubr.f32.mxu0 %v91_v54 }
  0x7a   :  { %954 = vmatmul.mubr.f32.gmra.mxu0 %v92_v55 }
  0x7b   :  { %956 = vmatprep.mubr.f32.mxu0 %v93_v56 }
  0x7e   :  { %957 = vmatmul.mubr.f32.gmra.mxu0 %v94_v57 }
  0x7f   :  { %959 = vmatprep.mubr.f32.mxu0 %v95_v58 }
  0x82   :  { %960 = vmatmul.mubr.f32.gmra.mxu0 %v96_v59 }
 0x106   :  { %v916_v1 = vpop.f32.mrf.mxu0 }
 0x107   :  { %v192_v2 = vadd.f32 %v916_v1, %v1187_v0 }
 0x108   :  { %v186_v3 = vpop.f32.mrf.mxu0 }
 0x109   :  { %v187_v4 = vadd.f32 %v1187_v0, %v186_v3  ;;  %v346_v7 = vmax.f32 %v192_v2, 0.0 }
 0x10a   :  { %v919_v5 = vpop.f32.mrf.mxu0 }
 0x10b   :  { %v345_v6 = vmax.f32 %v187_v4, 0.0  ;;  %v202_v8 = vadd.f32 %v919_v5, %v1187_v0 }
 0x10c   :  { %v196_v9 = vpop.f32.mrf.mxu0 }
 0x10d   :  { %v197_v10 = vadd.f32 %v1187_v0, %v196_v9  ;;  %994 = vmatprep.mubr.f32.mxu1 %v345_v6  ;;  %v348_v13 = vmax.f32 %v202_v8, 0.0 }
 0x10e   :  { %v922_v11 = vpop.f32.mrf.mxu0  ;;  %995 = vmatmul.mubr.f32.vlgmr.msra.gmra.mxu1 %v346_v7 }
 0x10f   :  { %v347_v12 = vmax.f32 %v197_v10, 0.0  ;;  %v212_v14 = vadd.f32 %v922_v11, %v1187_v0 }
 0x110   :  { %v206_v15 = vpop.f32.mrf.mxu0 }
 0x111   :  { %v207_v16 = vadd.f32 %v1187_v0, %v206_v15  ;;  %997 = vmatprep.mubr.f32.mxu1 %v347_v12  ;;  %v350_v19 = vmax.f32 %v212_v14, 0.0 }
 0x112   :  { %v925_v17 = vpop.f32.mrf.mxu0  ;;  %998 = vmatmul.mubr.f32.gmra.mxu1 %v348_v13 }
 0x113   :  { %v349_v18 = vmax.f32 %v207_v16, 0.0  ;;  %v222_v20 = vadd.f32 %v925_v17, %v1187_v0 }
 0x114   :  { %v216_v21 = vpop.f32.mrf.mxu0 }
 0x115   :  { %v217_v22 = vadd.f32 %v1187_v0, %v216_v21  ;;  %1000 = vmatprep.mubr.f32.mxu1 %v349_v18  ;;  %v352_v25 = vmax.f32 %v222_v20, 0.0 }
 0x116   :  { %v928_v23 = vpop.f32.mrf.mxu0  ;;  %1001 = vmatmul.mubr.f32.gmra.mxu1 %v350_v19 }
 0x117   :  { %v351_v24 = vmax.f32 %v217_v22, 0.0  ;;  %v232_v26 = vadd.f32 %v928_v23, %v1187_v0 }
 0x118   :  { %v226_v27 = vpop.f32.mrf.mxu0 }
 0x119   :  { %v227_v28 = vadd.f32 %v1187_v0, %v226_v27  ;;  %1003 = vmatprep.mubr.f32.mxu1 %v351_v24  ;;  %v354_v31 = vmax.f32 %v232_v26, 0.0 }
 0x11a   :  { %v931_v29 = vpop.f32.mrf.mxu0  ;;  %1004 = vmatmul.mubr.f32.gmra.mxu1 %v352_v25 }
 0x11b   :  { %v353_v30 = vmax.f32 %v227_v28, 0.0  ;;  %v242_v32 = vadd.f32 %v931_v29, %v1187_v0 }
 0x11c   :  { %v236_v33 = vpop.f32.mrf.mxu0 }
 0x11d   :  { %v237_v34 = vadd.f32 %v1187_v0, %v236_v33  ;;  %1006 = vmatprep.mubr.f32.mxu1 %v353_v30  ;;  %v356_v37 = vmax.f32 %v242_v32, 0.0 }
 0x11e   :  { %v934_v35 = vpop.f32.mrf.mxu0  ;;  %1007 = vmatmul.mubr.f32.gmra.mxu1 %v354_v31 }
 0x11f   :  { %v355_v36 = vmax.f32 %v237_v34, 0.0  ;;  %v252_v38 = vadd.f32 %v934_v35, %v1187_v0  ;;  %v1224_v34 = vld [vmem:[%s1318_s5] sm:$0xf] }
 0x120   :  { %v246_v39 = vpop.f32.mrf.mxu0  ;;  %880 = vmatprep.mubr.f32.mxu0 %v1224_v34 }
 0x121   :  { %v247_v40 = vadd.f32 %v1187_v0, %v246_v39  ;;  %1009 = vmatprep.mubr.f32.mxu1 %v355_v36  ;;  %v358_v43 = vmax.f32 %v252_v38, 0.0 }
 0x122   :  { %v937_v41 = vpop.f32.mrf.mxu0  ;;  %1010 = vmatmul.mubr.f32.gmra.mxu1 %v356_v37 }
 0x123   :  { %v357_v42 = vmax.f32 %v247_v40, 0.0  ;;  %v262_v44 = vadd.f32 %v937_v41, %v1187_v0 }
 0x124   :  { %v256_v45 = vpop.f32.mrf.mxu0 }
 0x125   :  { %v257_v46 = vadd.f32 %v1187_v0, %v256_v45  ;;  %1012 = vmatprep.mubr.f32.mxu1 %v357_v42  ;;  %v360_v49 = vmax.f32 %v262_v44, 0.0 }
 0x126   :  { %v940_v47 = vpop.f32.mrf.mxu0  ;;  %1013 = vmatmul.mubr.f32.gmra.mxu1 %v358_v43 }
 0x127   :  { %v359_v48 = vmax.f32 %v257_v46, 0.0  ;;  %v272_v50 = vadd.f32 %v940_v47, %v1187_v0 }
 0x128   :  { %v266_v51 = vpop.f32.mrf.mxu0 }
 0x129   :  { %v267_v52 = vadd.f32 %v1187_v0, %v266_v51  ;;  %1015 = vmatprep.mubr.f32.mxu1 %v359_v48  ;;  %v362_v55 = vmax.f32 %v272_v50, 0.0 }
 0x12a   :  { %v943_v53 = vpop.f32.mrf.mxu0  ;;  %1016 = vmatmul.mubr.f32.gmra.mxu1 %v360_v49 }
 0x12b   :  { %v361_v54 = vmax.f32 %v267_v52, 0.0  ;;  %v282_v56 = vadd.f32 %v943_v53, %v1187_v0 }
 0x12c   :  { %v276_v57 = vpop.f32.mrf.mxu0 }
 0x12d   :  { %v277_v58 = vadd.f32 %v1187_v0, %v276_v57  ;;  %1018 = vmatprep.mubr.f32.mxu1 %v361_v54  ;;  %v364_v61 = vmax.f32 %v282_v56, 0.0 }
 0x12e   :  { %v946_v59 = vpop.f32.mrf.mxu0  ;;  %1019 = vmatmul.mubr.f32.gmra.mxu1 %v362_v55 }
 0x12f   :  { %v363_v60 = vmax.f32 %v277_v58, 0.0  ;;  %v292_v62 = vadd.f32 %v946_v59, %v1187_v0 }
 0x130   :  { %v286_v63 = vpop.f32.mrf.mxu0 }
 0x131   :  { %v287_v1 = vadd.f32 %v1187_v0, %v286_v63  ;;  %1021 = vmatprep.mubr.f32.mxu1 %v363_v60  ;;  %v366_v4 = vmax.f32 %v292_v62, 0.0 }
 0x132   :  { %v949_v2 = vpop.f32.mrf.mxu0  ;;  %1022 = vmatmul.mubr.f32.gmra.mxu1 %v364_v61 }
 0x133   :  { %v365_v3 = vmax.f32 %v287_v1, 0.0  ;;  %v302_v5 = vadd.f32 %v949_v2, %v1187_v0  ;;  %v1260_v1 = vld [vmem:[%s1317_s4] ss:$0 sm:$0xff]  ;;  %s1139_s4 = smov [#allocation8]  }
 0x134   :  { %v296_v6 = vpop.f32.mrf.mxu0  ;;  %s740_s15 = sshll.u32 %s1139_s4, 4  ;;  %s741_s15 = int_to_ptr.vmem [resolvable:$true] %s740_s15 }
 0x135   :  { %v297_v7 = vadd.f32 %v1187_v0, %v296_v6  ;;  %1024 = vmatprep.mubr.f32.mxu1 %v365_v3  ;;  %v368_v10 = vmax.f32 %v302_v5, 0.0  ;;  %s1108_s16 = scalar_lea.vmem %s741_s15, 128  ;;  %p1113_p2 = scmp.lt.s32.totalorder %s741_s15, %s741_s15 }
 0x136   :  { %v952_v8 = vpop.f32.mrf.mxu0  ;;  %1025 = vmatmul.mubr.f32.gmra.mxu1 %v366_v4  ;;  %p1109_p1 = scmp.ne.s32.totalorder %s741_s15, %s1108_s16  ;;  %p1114_p3 = scmp.lt.s32.totalorder %s1108_s16, %s1108_s16 }
 0x137   :  { %v367_v9 = vmax.f32 %v297_v7, 0.0  ;;  %v312_v11 = vadd.f32 %v952_v8, %v1187_v0 }
 0x138   :  { %v306_v12 = vpop.f32.mrf.mxu0  ;;  %p1115_p4 = por %p1114_p3, %p1113_p2 }
 0x139   :  { %v307_v13 = vadd.f32 %v1187_v0, %v306_v12  ;;  %1027 = vmatprep.mubr.f32.mxu1 %v367_v9  ;;  %v370_v16 = vmax.f32 %v312_v11, 0.0 }
 0x13a   :  { %v955_v14 = vpop.f32.mrf.mxu0  ;;  %1028 = vmatmul.mubr.f32.gmra.mxu1 %v368_v10  ;;  %p1116_p5 = pnand %p1115_p4, %p1109_p1 }
 0x13b   :  { %v369_v15 = vmax.f32 %v307_v13, 0.0  ;;  %v322_v17 = vadd.f32 %v955_v14, %v1187_v0 }
 0x13c   :  { %v316_v18 = vpop.f32.mrf.mxu0 }
 0x13d   :  { %v317_v19 = vadd.f32 %v1187_v0, %v316_v18  ;;  %1030 = vmatprep.mubr.f32.mxu1 %v369_v15  ;;  %v372_v22 = vmax.f32 %v322_v17, 0.0 }
 0x13e   :  { %v958_v20 = vpop.f32.mrf.mxu0  ;;  %1031 = vmatmul.mubr.f32.gmra.mxu1 %v370_v16 }
 0x13f   :  { %v371_v21 = vmax.f32 %v317_v19, 0.0  ;;  %v332_v23 = vadd.f32 %v958_v20, %v1187_v0 }
 0x140   :  { %v326_v24 = vpop.f32.mrf.mxu0 }
 0x141   :  { %v327_v25 = vadd.f32 %v1187_v0, %v326_v24  ;;  %1033 = vmatprep.mubr.f32.mxu1 %v371_v21  ;;  %v374_v28 = vmax.f32 %v332_v23, 0.0 }
 0x142   :  { %v961_v26 = vpop.f32.mrf.mxu0  ;;  %1034 = vmatmul.mubr.f32.gmra.mxu1 %v372_v22 }
 0x143   :  { %v373_v27 = vmax.f32 %v327_v25, 0.0  ;;  %v342_v29 = vadd.f32 %v961_v26, %v1187_v0 }
 0x144   :  { %v336_v30 = vpop.f32.mrf.mxu0 }
 0x145   :  { %v337_v31 = vadd.f32 %v1187_v0, %v336_v30  ;;  %1036 = vmatprep.mubr.f32.mxu1 %v373_v27  ;;  %v376_v33 = vmax.f32 %v342_v29, 0.0 }
 0x146   :  { %1037 = vmatmul.mubr.f32.gmra.mxu1 %v374_v28 }
 0x147   :  { %v375_v32 = vmax.f32 %v337_v31, 0.0 }
 0x149   :  { %1039 = vmatprep.mubr.f32.mxu1 %v375_v32 }
 0x14a   :  { %1040 = vmatmul.mubr.f32.gmra.mxu1 %v376_v33 }
 0x1ce   :  { %v1227_v35 = vpop.f32.mrf.mxu1 }
 0x1d0   :  { %v1229_v36 = vpop.f32.mrf.mxu1 }
 0x1d2   :  { %v1231_v37 = vpop.f32.mrf.mxu1 }
 0x1d4   :  { %v1233_v0 = vpop.f32.mrf.mxu1 }
 0x1d6   :  { %v1235_v38 = vpop.f32.mrf.mxu1 }
 0x1d8   :  { %v1237_v39 = vpop.f32.mrf.mxu1 }
 0x1da   :  { %v1239_v40 = vpop.f32.mrf.mxu1 }
 0x1dc   :  { %v1241_v41 = vpop.f32.mrf.mxu1 }
 0x1de   :  { %v1008_v42 = vpop.f32.mrf.mxu1 }
 0x1df   :  { %v512_v28 = vadd.f32 %v1008_v42, %v1260_v1 }
 0x1e0   :  { %v1243_v43 = vpop.f32.mrf.mxu1 }
 0x1e1   :  { %v634_v32 = vmax.f32 %v512_v28, 0.0  ;;  %v507_v33 = vadd.f32 %v1260_v1, %v1243_v43 }
 0x1e2   :  { %v1011_v44 = vpop.f32.mrf.mxu1 }
 0x1e3   :  { %v522_v20 = vadd.f32 %v1011_v44, %v1260_v1 }
 0x1e4   :  { %v516_v45 = vpop.f32.mrf.mxu1 }
 0x1e5   :  { %v636_v24 = vmax.f32 %v522_v20, 0.0  ;;  %v517_v25 = vadd.f32 %v1260_v1, %v516_v45 }
 0x1e6   :  { %v1014_v46 = vpop.f32.mrf.mxu1 }
 0x1e7   :  { %v532_v12 = vadd.f32 %v1014_v46, %v1260_v1  ;;  %v635_v29 = vmax.f32 %v517_v25, 0.0  ;;  %v502_v46 = vadd.f32 %v1239_v40, %v1260_v1 }
 0x1e8   :  { %v526_v47 = vpop.f32.mrf.mxu1 }
 0x1e9   :  { %v638_v16 = vmax.f32 %v532_v12, 0.0  ;;  %v527_v17 = vadd.f32 %v1260_v1, %v526_v47  ;;  %v633_v47 = vmax.f32 %v507_v33, 0.0 }
 0x1ea   :  { %v1017_v48 = vpop.f32.mrf.mxu1 }
 0x1eb   :  { %v542_v2 = vadd.f32 %v1017_v48, %v1260_v1  ;;  %v637_v21 = vmax.f32 %v527_v17, 0.0 }
 0x1ec   :  { %v536_v49 = vpop.f32.mrf.mxu1 }
 0x1ed   :  { %v640_v8 = vmax.f32 %v542_v2, 0.0  ;;  %v537_v9 = vadd.f32 %v1260_v1, %v536_v49  ;;  %v632_v49 = vmax.f32 %v502_v46, 0.0 }
 0x1ee   :  { %v1245_v50 = vpop.f32.mrf.mxu1 }
 0x1ef   :  { %v639_v13 = vmax.f32 %v537_v9, 0.0 }
 0x1f0   :  { %v1247_v51 = vpop.f32.mrf.mxu1 }
 0x1f2   :  { %v1249_v52 = vpop.f32.mrf.mxu1 }
 0x1f4   :  { %v1251_v53 = vpop.f32.mrf.mxu1 }
 0x1f6   :  { %v1253_v54 = vpop.f32.mrf.mxu1 }
 0x1f7   :  { %v572_v43 = vadd.f32 %v1253_v54, %v1260_v1  ;;  %v562_v54 = vadd.f32 %v1249_v52, %v1260_v1  ;;  %v552_v52 = vadd.f32 %v1245_v50, %v1260_v1 }
 0x1f8   :  { %v1255_v55 = vpop.f32.mrf.mxu1 }
 0x1f9   :  { %v644_v2 = vmax.f32 %v562_v54, 0.0 }
 0x1fa   :  { %v1029_v56 = vpop.f32.mrf.mxu1 }
 0x1fb   :  { %v582_v44 = vadd.f32 %v1029_v56, %v1260_v1 }
 0x1fc   :  { %v576_v57 = vpop.f32.mrf.mxu1 }
 0x1fd   :  { %v648_v42 = vmax.f32 %v582_v44, 0.0  ;;  %v577_v48 = vadd.f32 %v1260_v1, %v576_v57  ;;  %v567_v57 = vadd.f32 %v1260_v1, %v1255_v55  ;;  %v557_v55 = vadd.f32 %v1260_v1, %v1251_v53 }
 0x1fe   :  { %v1032_v58 = vpop.f32.mrf.mxu1  ;;  %v547_v53 = vadd.f32 %v1260_v1, %v1247_v51 }
 0x1ff   :  { %v592_v26 = vadd.f32 %v1032_v58, %v1260_v1  ;;  %v497_v58 = vadd.f32 %v1260_v1, %v1241_v41  ;;  %v647_v56 = vmax.f32 %v577_v48, 0.0  ;;  %v487_v41 = vadd.f32 %v1260_v1, %v1237_v39 }
 0x200   :  { %v586_v59 = vpop.f32.mrf.mxu1  ;;  %v477_v39 = vadd.f32 %v1260_v1, %v1233_v0  ;;  %v467_v0 = vadd.f32 %v1260_v1, %v1229_v36 }
 0x201   :  { %v650_v30 = vmax.f32 %v592_v26, 0.0  ;;  %v587_v31 = vadd.f32 %v1260_v1, %v586_v59  ;;  %v492_v59 = vadd.f32 %v1235_v38, %v1260_v1  ;;  %v631_v40 = vmax.f32 %v497_v58, 0.0 }
 0x202   :  { %v1035_v60 = vpop.f32.mrf.mxu1  ;;  %v482_v38 = vadd.f32 %v1231_v37, %v1260_v1  ;;  %v472_v37 = vadd.f32 %v1227_v35, %v1260_v1  ;;  %v625_v50 = vmax.f32 %v467_v0, 0.0 }
 0x203   :  { %v602_v18 = vadd.f32 %v1035_v60, %v1260_v1  ;;  %v649_v45 = vmax.f32 %v587_v31, 0.0  ;;  %v646_v60 = vmax.f32 %v572_v43, 0.0 }
 0x204   :  { %v596_v61 = vpop.f32.mrf.mxu1 }
 0x205   :  { %v652_v22 = vmax.f32 %v602_v18, 0.0  ;;  %v597_v23 = vadd.f32 %v1260_v1, %v596_v61  ;;  %v630_v61 = vmax.f32 %v492_v59, 0.0 }
 0x206   :  { %v1038_v62 = vpop.f32.mrf.mxu1 }
 0x207   :  { %v612_v10 = vadd.f32 %v1038_v62, %v1260_v1  ;;  %v651_v27 = vmax.f32 %v597_v23, 0.0  ;;  %v645_v62 = vmax.f32 %v567_v57, 0.0 }
 0x208   :  { %v606_v63 = vpop.f32.mrf.mxu1 }
 0x209   :  { %v654_v14 = vmax.f32 %v612_v10, 0.0  ;;  %v607_v15 = vadd.f32 %v1260_v1, %v606_v63  ;;  %v629_v63 = vmax.f32 %v487_v41, 0.0 }
 0x20a   :  { %v1041_v3 = vpop.f32.mrf.mxu1 }
 0x20b   :  { %v622_v4 = vadd.f32 %v1041_v3, %v1260_v1  ;;  %v653_v19 = vmax.f32 %v607_v15, 0.0  ;;  %v628_v3 = vmax.f32 %v482_v38, 0.0 }
 0x20c   :  { %v616_v5 = vpop.f32.mrf.mxu1 }
 0x20d   :  { %v656_v6 = vmax.f32 %v622_v4, 0.0  ;;  %v617_v7 = vadd.f32 %v1260_v1, %v616_v5  ;;  %v643_v4 = vmax.f32 %v557_v55, 0.0  ;;  %v627_v5 = vmax.f32 %v477_v39, 0.0 }
 0x20f   :  { %v655_v11 = vmax.f32 %v617_v7, 0.0  ;;  %848 = vmatprep.subr.mxu0 %v656_v6  ;;  %v642_v6 = vmax.f32 %v552_v52, 0.0  ;;  %v626_v7 = vmax.f32 %v472_v37, 0.0 }
 0x210   :  { %849 = vmatpush3.xpose.msra.mxu0 %v640_v8  ;;  %v641_v8 = vmax.f32 %v547_v53, 0.0 }
 0x211   :  { %850 = vmatprep.subr.mxu0 %v655_v11 }
 0x214   :  { %851 = vmatpush3.xpose.msra.mxu0 %v639_v13 }
 0x215   :  { %852 = vmatprep.subr.mxu0 %v654_v14 }
 0x218   :  { %853 = vmatpush3.xpose.msra.mxu0 %v638_v16 }
 0x219   :  { %854 = vmatprep.subr.mxu0 %v653_v19 }
 0x21c   :  { %855 = vmatpush3.xpose.msra.mxu0 %v637_v21 }
 0x21d   :  { %856 = vmatprep.subr.mxu0 %v652_v22 }
 0x220   :  { %857 = vmatpush3.xpose.msra.mxu0 %v636_v24 }
 0x221   :  { %858 = vmatprep.subr.mxu0 %v651_v27 }
 0x224   :  { %859 = vmatpush3.xpose.msra.mxu0 %v635_v29 }
 0x225   :  { %860 = vmatprep.subr.mxu0 %v650_v30 }
 0x228   :  { %861 = vmatpush3.xpose.msra.mxu0 %v634_v32 }
 0x229   :  { %862 = vmatprep.subr.mxu0 %v649_v45 }
 0x22c   :  { %863 = vmatpush3.xpose.msra.mxu0 %v633_v47 }
 0x22d   :  { %864 = vmatprep.subr.mxu0 %v648_v42 }
 0x230   :  { %865 = vmatpush3.xpose.msra.mxu0 %v632_v49 }
 0x231   :  { %866 = vmatprep.subr.mxu0 %v647_v56 }
 0x234   :  { %867 = vmatpush3.xpose.msra.mxu0 %v631_v40 }
 0x235   :  { %868 = vmatprep.subr.mxu0 %v646_v60 }
 0x238   :  { %869 = vmatpush3.xpose.msra.mxu0 %v630_v61 }
 0x239   :  { %870 = vmatprep.subr.mxu0 %v645_v62 }
 0x23c   :  { %871 = vmatpush3.xpose.msra.mxu0 %v629_v63 }
 0x23d   :  { %872 = vmatprep.subr.mxu0 %v644_v2 }
 0x240   :  { %873 = vmatpush3.xpose.msra.mxu0 %v628_v3 }
 0x241   :  { %874 = vmatprep.subr.mxu0 %v643_v4 }
 0x244   :  { %875 = vmatpush3.xpose.msra.mxu0 %v627_v5 }
 0x245   :  { %876 = vmatprep.subr.mxu0 %v642_v6 }
 0x248   :  { %877 = vmatpush3.xpose.msra.mxu0 %v626_v7 }
 0x249   :  { %878 = vmatprep.subr.mxu0 %v641_v8 }
 0x24c   :  { %879 = vmatpush3.xpose.msra.mxu0 %v625_v50 }
 0x24f   :  { %881 = vmatmul.mubr.f32.vlgmr.msra.gmra.mxu0 %v1224_v34 }
 0x30f   :  { %v724_v9 = vpop.f32.mrf.mxu0 }
 0x311   :  { %v726_v35 = vpop.f32.mrf.mxu0 }
 0x312   :  { %v731_v10 = vcombine.low %v724_v9, %v726_v35 }
 0x314   :  { %733 = vst [vmem:[#allocation8] sm:$0xff] %v731_v10 }
 0x315   :  { %1119 = shalt.err (!%p1116_p5)
}
 0x316   :  { %743 = dma.vmem_to_hbm [thread:$0]  %s741_s15, 128, %s1319_s6, [#allocation4]  }
 0x317   :  { %1132 = dma.done.wait [#allocation4], 128  }
 0x318   :  { %1133 = vsyncadd [#allocation4], 4294967168 }
 0x319   :  { %747 = vsyncpa [#allocation3], 1 }
 0x31a   :  { %748 = vsyncpa [#allocation6], 1 }
 0x31b   :  { %749 = vsyncpa [#allocation4], 1 }

</bundles_post_ra>
